<compile_context>
chip_gen: v5e
topology: v5e:2x2
jax: 0.10.0
libtpu: 0.0.40
codegen_flags: <defaults>
</compile_context>

<pallas_src>
import functools

import numpy as np
import jax
import jax.numpy as jnp
from jax import lax
from jax.experimental import pallas as pl
from jax.experimental.pallas import tpu as pltpu

_LN_EPS = 1e-5
_ACTIVATIONS = ("relu", "lrelu", "tanh", "selu", "none")


def _round_up(x, m):
    return ((x + m - 1) // m) * m


def _vmem_capacity_bytes():
    try:
        cap = getattr(pltpu.get_tpu_info(), "vmem_capacity_bytes", None)
        if cap:
            return int(cap)
    except Exception:
        pass
    return 64 << 20        # conservative fallback: v7x per-TensorCore capacity


def _apply_activation(out, activation):
    if activation == "relu":
        return jnp.maximum(out, 0.0)
    if activation == "lrelu":
        return jnp.where(out >= 0.0, out, 0.2 * out)
    if activation == "tanh":
        return jnp.tanh(out)
    if activation == "selu":
        alpha = 1.6732632423543772
        scale = 1.0507009873554805
        return scale * jnp.where(out >= 0.0, out, alpha * (jnp.exp(out) - 1.0))
    return out             # "none"


def _accumulate(x_ref, w_ref, acc_ref):
    # x: (tm, tk), w: (tk, tn) -> standard NN matmul, MXU-native (weight is
    # pre-transposed once in the wrapper; no in-kernel vxpose per K-step).
    @pl.when(pl.program_id(2) == 0)
    def _():
        acc_ref[...] = jnp.zeros_like(acc_ref)

    acc_ref[...] += jnp.dot(x_ref[...], w_ref[...],
                            preferred_element_type=jnp.float32)


def _linear_kernel(x_ref, w_ref, b_ref, o_ref, acc_ref, *, activation):
    _accumulate(x_ref, w_ref, acc_ref)

    @pl.when(pl.program_id(2) == pl.num_programs(2) - 1)
    def _():
        out = acc_ref[...] + b_ref[...].astype(jnp.float32)
        o_ref[...] = _apply_activation(out, activation).astype(o_ref.dtype)


def _linear_ln_kernel(x_ref, w_ref, b_ref, g_ref, beta_ref, o_ref, acc_ref,
                      *, activation, inv_n):
    # Single-pass LN: full (padded) output row resident.  Stats are exact
    # because padded weight columns AND bias/gamma/beta padding are zero.
    _accumulate(x_ref, w_ref, acc_ref)

    @pl.when(pl.program_id(2) == pl.num_programs(2) - 1)
    def _():
        out = acc_ref[...] + b_ref[...].astype(jnp.float32)
        s = jnp.sum(out, axis=-1, keepdims=True)
        ss = jnp.sum(out * out, axis=-1, keepdims=True)
        mean = s * inv_n
        var = jnp.maximum(ss * inv_n - mean * mean, 0.0)   # clamp: no NaN
        out = (out - mean) * lax.rsqrt(var + _LN_EPS)
        out = (out * g_ref[...].astype(jnp.float32)
               + beta_ref[...].astype(jnp.float32))
        o_ref[...] = _apply_activation(out, activation).astype(o_ref.dtype)


def _linear_stats_kernel(x_ref, w_ref, b_ref, h_ref, sum_ref, sq_ref,
                         acc_ref, s_sc, q_sc):
    # Two-pass LN, pass 1: tiled-N matmul + bias, plus per-row running
    # sum / sum-of-squares accumulated across the N-tile (j) axis.
    j = pl.program_id(1)
    k = pl.program_id(2)
    last_j = pl.num_programs(1) - 1
    last_k = pl.num_programs(2) - 1

    @pl.when((j == 0) & (k == 0))
    def _():
        s_sc[...] = jnp.zeros_like(s_sc)
        q_sc[...] = jnp.zeros_like(q_sc)

    _accumulate(x_ref, w_ref, acc_ref)

    @pl.when(k == last_k)
    def _():
        h = acc_ref[...] + b_ref[...].astype(jnp.float32)
        h_ref[...] = h
        s_sc[...] += jnp.sum(h, axis=-1, keepdims=True)
        q_sc[...] += jnp.sum(h * h, axis=-1, keepdims=True)

    @pl.when((j == last_j) & (k == last_k))
    def _():
        sum_ref[...] = jnp.broadcast_to(s_sc[...], sum_ref.shape)
        sq_ref[...] = jnp.broadcast_to(q_sc[...], sq_ref.shape)


def _ln_finalize_kernel(h_ref, sum_ref, sq_ref, g_ref, beta_ref, o_ref,
                        *, activation, inv_n):
    # Two-pass LN, pass 2: normalize each (tm, tn) tile using the row stats.
    h = h_ref[...]
    s_full = sum_ref[...]
    q_full = sq_ref[...]
    mean = s_full[:, 0:1] * inv_n
    var = jnp.maximum(q_full[:, 0:1] * inv_n - mean * mean, 0.0)
    out = (h - mean) * lax.rsqrt(var + _LN_EPS)
    out = (out * g_ref[...].astype(jnp.float32)
           + beta_ref[...].astype(jnp.float32))
    o_ref[...] = _apply_activation(out, activation).astype(o_ref.dtype)


def linear_block_forward(x, weight, bias, gamma=None, beta=None, *,
                         norm="none", activation="relu",
                         matmul_dtype=None, ln_two_pass=None):
    """Fused Linear (+ optional LayerNorm) (+ activation) forward pass.

    x:      (..., K) float32
    weight: (N, K)   float32   -- PyTorch nn.Linear layout (out, in)
    bias:   (N,)     float32
    gamma/beta: (N,) float32   (required for norm='ln')
    matmul_dtype: optional dtype for MXU operands (e.g. jnp.bfloat16 on
        v6e/v7x); accumulation and epilogue stay in float32.  Kept opt-in so
        the default matches the f32 PyTorch module numerics.
    ln_two_pass: None = auto (two-pass tiled-N LN only when the full-N tile
        would blow the VMEM budget); True/False force the path.
    """
    if norm not in ("none", "ln"):
        # TODO(synk): 'bn'/'in' need running / per-sample channel stats.
        raise ValueError(f"Unsupported normalization: {norm}")
    if activation not in _ACTIVATIONS:
        # TODO(synk): 'prelu' has a learnable slope parameter; not wired in.
        raise ValueError(f"Unsupported activation: {activation}")
    if norm == "ln" and (gamma is None or beta is None):
        raise ValueError("norm='ln' requires gamma and beta")

    *lead, K = x.shape
    M = 1
    for d in lead:
        M *= d
    N, K_w = weight.shape
    assert K_w == K, "weight inner dim must match x inner dim"

    x2 = x.reshape(M, K)
    # One wrapper-level transpose of a static parameter (constant-folded under
    # jit) so the kernel runs a plain (M,K)x(K,N) matmul.
    w_t = weight.T                                    # (K, N)

    mm_dtype = None if matmul_dtype is None else np.dtype(matmul_dtype)
    out_dtype = x.dtype
    in_bytes = mm_dtype.itemsize if mm_dtype is not None else np.dtype(x.dtype).itemsize
    out_bytes = np.dtype(out_dtype).itemsize
    if mm_dtype is not None and mm_dtype.itemsize == 1:
        row_align = 32                                # future fp8/int8 path
    elif (mm_dtype is not None and mm_dtype.itemsize == 2) or out_bytes == 2:
        row_align = 16                                # bf16 packs 2 rows/sublane
    else:
        row_align = 8

    # ---- generation-aware tile budget ------------------------------------
    vmem_cap = _vmem_capacity_bytes()
    if vmem_cap >= (96 << 20):                        # v5e / v6e (128 MiB VMEM)
        tile_budget = 72 << 20
        tm_cap, tn_cap, tk_cap = 512, 512, 1024
        split_for_two_cores = False
    else:                                             # v7x (64 MiB per TC)
        tile_budget = 36 << 20
        tm_cap, tn_cap, tk_cap = 256, 512, 512
        split_for_two_cores = True
    vmem_limit = int(max(min(vmem_cap - (16 << 20), tile_budget + (24 << 20)),
                         32 << 20))

    def vmem_need(tm_, tn_, tk_, n_vec, n_stats, out_b):
        b = 2 * (tm_ * tk_ + tk_ * tn_) * in_bytes    # x / w (double-buffered)
        b += 2 * n_vec * tn_ * 4                      # bias / gamma / beta
        b += 2 * tm_ * tn_ * out_b                    # main output tile
        b += 2 * n_stats * tm_ * 128 * 4              # stats outputs (pass 1)
        b += tm_ * tn_ * 4                            # f32 accumulator scratch
        b += (2 * tm_ * 4 if n_stats else 0)          # sum/sumsq scratches
        return b

    def shrink(tm_, tn_, tk_, *, can_shrink_tn, n_vec, n_stats, out_b):
        while vmem_need(tm_, tn_, tk_, n_vec, n_stats, out_b) > tile_budget and tk_ > 128:
            tk_ = max(128, _round_up(tk_ // 2, 128))
        while (can_shrink_tn and tn_ > 128
               and vmem_need(tm_, tn_, tk_, n_vec, n_stats, out_b) > tile_budget):
            tn_ = max(128, _round_up(tn_ // 2, 128))
        while vmem_need(tm_, tn_, tk_, n_vec, n_stats, out_b) > tile_budget and tm_ > row_align:
            tm_ = max(row_align, _round_up(tm_ // 2, row_align))
        return tm_, tn_, tk_

    # ---- base tile sizes ---------------------------------------------------
    tm = min(_round_up(M, row_align), tm_cap)
    if K % 128 == 0:                                  # prefer divisors of K
        tk, d = 128, 128
        while d <= min(K, tk_cap):
            if K % d == 0:
                tk = d
            d += 128
    else:
        tk = min(_round_up(K, 128), tk_cap)
    n128 = _round_up(N, 128)

    if norm == "ln" and ln_two_pass is None:
        # Single-pass (full-N-resident) LN only while it fits the budget with
        # healthy MXU tiles; otherwise tile N and finalize in a second pass.
        ln_two_pass = vmem_need(tm, n128, min(tk, 512), 3, 0, out_bytes) > tile_budget

    transcend = M * N if activation in ("tanh", "selu") else 0

    def pad2(a, rows, cols):
        pr, pc = rows - a.shape[0], cols - a.shape[1]
        return a if (pr == 0 and pc == 0) else jnp.pad(a, ((0, pr), (0, pc)))

    def padded_operands(tm_, tn_, tk_):
        M_pad = _round_up(M, tm_)
        K_pad = _round_up(K, tk_)
        N_pad = _round_up(N, tn_)
        xp = x2.astype(mm_dtype) if mm_dtype is not None else x2
        wp = w_t.astype(mm_dtype) if mm_dtype is not None else w_t
        xp = pad2(xp, M_pad, K_pad)                   # skipped when aligned
        # Zero padding of weight columns AND bias/gamma/beta keeps padded
        # output columns exactly zero -> LN stats with 1/N stay exact.
        wp = pad2(wp, K_pad, N_pad)
        bp = pad2(bias.reshape(1, N), 1, N_pad)
        return M_pad, K_pad, N_pad, xp, wp, bp

    # =========================== norm == 'none' =============================
    if norm == "none":
        tn = min(n128, tn_cap)
        if (split_for_two_cores and _round_up(M, tm) == tm
                and n128 >= 256 and tn == n128):
            # Give both v7x TensorCores work when there is only one M tile.
            tn = max(128, _round_up(n128 // 2, 128))
        tm, tn, tk = shrink(tm, tn, tk, can_shrink_tn=True,
                            n_vec=1, n_stats=0, out_b=out_bytes)
        M_pad, K_pad, N_pad, x_p, w_p, b_p = padded_operands(tm, tn, tk)
        grid = (M_pad // tm, N_pad // tn, K_pad // tk)
        cost = pl.CostEstimate(
            flops=2 * M * N * K, transcendentals=transcend,
            bytes_accessed=M * K * in_bytes + K * N * in_bytes + M * N * out_bytes)
        out = pl.pallas_call(
            functools.partial(_linear_kernel, activation=activation),
            out_shape=jax.ShapeDtypeStruct((M_pad, N_pad), out_dtype),
            grid_spec=pltpu.PrefetchScalarGridSpec(
                num_scalar_prefetch=0, grid=grid,
                in_specs=[pl.BlockSpec((tm, tk), lambda i, j, k: (i, k)),
                          pl.BlockSpec((tk, tn), lambda i, j, k: (k, j)),
                          pl.BlockSpec((1, tn), lambda i, j, k: (0, j))],
                out_specs=pl.BlockSpec((tm, tn), lambda i, j, k: (i, j)),
                scratch_shapes=[pltpu.VMEM((tm, tn), jnp.float32)]),
            compiler_params=pltpu.CompilerParams(
                dimension_semantics=("parallel", "parallel", "arbitrary"),
                vmem_limit_bytes=vmem_limit),
            cost_estimate=cost,
        )(x_p, w_p, b_p)
        return out[:M, :N].reshape(*lead, N)

    # =============================== LayerNorm ===============================
    inv_n = 1.0 / N
    g2 = gamma.reshape(1, N)
    be2 = beta.reshape(1, N)

    if not ln_two_pass:
        # ---- single pass: full output row resident --------------------------
        tn = n128
        tm, tn, tk = shrink(tm, tn, tk, can_shrink_tn=False,
                            n_vec=3, n_stats=0, out_b=out_bytes)
        M_pad, K_pad, N_pad, x_p, w_p, b_p = padded_operands(tm, tn, tk)
        g_p = pad2(g2, 1, N_pad)
        be_p = pad2(be2, 1, N_pad)
        grid = (M_pad // tm, N_pad // tn, K_pad // tk)      # N grid is 1
        vec_spec = pl.BlockSpec((1, tn), lambda i, j, k: (0, j))
        cost = pl.CostEstimate(
            flops=2 * M * N * K + 10 * M * N, transcendentals=transcend,
            bytes_accessed=M * K * in_bytes + K * N * in_bytes + M * N * out_bytes)
        out = pl.pallas_call(
            functools.partial(_linear_ln_kernel, activation=activation, inv_n=inv_n),
            out_shape=jax.ShapeDtypeStruct((M_pad, N_pad), out_dtype),
            grid_spec=pltpu.PrefetchScalarGridSpec(
                num_scalar_prefetch=0, grid=grid,
                in_specs=[pl.BlockSpec((tm, tk), lambda i, j, k: (i, k)),
                          pl.BlockSpec((tk, tn), lambda i, j, k: (k, j)),
                          vec_spec, vec_spec, vec_spec],
                out_specs=pl.BlockSpec((tm, tn), lambda i, j, k: (i, j)),
                scratch_shapes=[pltpu.VMEM((tm, tn), jnp.float32)]),
            compiler_params=pltpu.CompilerParams(
                dimension_semantics=("parallel", "arbitrary", "arbitrary"),
                vmem_limit_bytes=vmem_limit),
            cost_estimate=cost,
        )(x_p, w_p, b_p, g_p, be_p)
        return out[:M, :N].reshape(*lead, N)

    # ---- two passes: tiled-N matmul + row stats, then finalize --------------
    tn = min(n128, tn_cap)
    tm, tn, tk = shrink(tm, tn, tk, can_shrink_tn=True,
                        n_vec=1, n_stats=2, out_b=4)
    M_pad, K_pad, N_pad, x_p, w_p, b_p = padded_operands(tm, tn, tk)
    g_p = pad2(g2, 1, N_pad)
    be_p = pad2(be2, 1, N_pad)
    grid = (M_pad // tm, N_pad // tn, K_pad // tk)
    stats_spec = pl.BlockSpec((tm, 128), lambda i, j, k: (i, 0))
    cost1 = pl.CostEstimate(
        flops=2 * M * N * K, transcendentals=0,
        bytes_accessed=M * K * in_bytes + K * N * in_bytes + M * N * 4)
    h, s, q = pl.pallas_call(
        _linear_stats_kernel,
        out_shape=(jax.ShapeDtypeStruct((M_pad, N_pad), jnp.float32),
                   jax.ShapeDtypeStruct((M_pad, 128), jnp.float32),
                   jax.ShapeDtypeStruct((M_pad, 128), jnp.float32)),
        grid_spec=pltpu.PrefetchScalarGridSpec(
            num_scalar_prefetch=0, grid=grid,
            in_specs=[pl.BlockSpec((tm, tk), lambda i, j, k: (i, k)),
                      pl.BlockSpec((tk, tn), lambda i, j, k: (k, j)),
                      pl.BlockSpec((1, tn), lambda i, j, k: (0, j))],
            out_specs=[pl.BlockSpec((tm, tn), lambda i, j, k: (i, j)),
                       stats_spec, stats_spec],
            scratch_shapes=[pltpu.VMEM((tm, tn), jnp.float32),
                            pltpu.VMEM((tm, 1), jnp.float32),
                            pltpu.VMEM((tm, 1), jnp.float32)]),
        compiler_params=pltpu.CompilerParams(
            # j/k must be "arbitrary": row-stat outputs/scratches accumulate
            # across both of those axes.
            dimension_semantics=("parallel", "arbitrary", "arbitrary"),
            vmem_limit_bytes=vmem_limit),
        cost_estimate=cost1,
    )(x_p, w_p, b_p)

    grid2 = (M_pad // tm, N_pad // tn)
    tile_spec2 = pl.BlockSpec((tm, tn), lambda i, j: (i, j))
    stats_spec2 = pl.BlockSpec((tm, 128), lambda i, j: (i, 0))
    vec_spec2 = pl.BlockSpec((1, tn), lambda i, j: (0, j))
    cost2 = pl.CostEstimate(
        flops=8 * M * N, transcendentals=transcend,
        bytes_accessed=M * N * 4 + M * N * out_bytes)
    out = pl.pallas_call(
        functools.partial(_ln_finalize_kernel, activation=activation, inv_n=inv_n),
        out_shape=jax.ShapeDtypeStruct((M_pad, N_pad), out_dtype),
        grid_spec=pltpu.PrefetchScalarGridSpec(
            num_scalar_prefetch=0, grid=grid2,
            in_specs=[tile_spec2, stats_spec2, stats_spec2, vec_spec2, vec_spec2],
            out_specs=tile_spec2),
        compiler_params=pltpu.CompilerParams(
            dimension_semantics=("parallel", "parallel"),
            vmem_limit_bytes=vmem_limit),
        cost_estimate=cost2,
    )(h, s, q, g_p, be_p)
    return out[:M, :N].reshape(*lead, N)


if __name__ == "__main__":
    input_dim, output_dim = 32, 32

    key = jax.random.PRNGKey(0)
    kx, kw, kb, kx2 = jax.random.split(key, 4)

    # Deterministic synthetic parameters (nn.Linear(input_dim, output_dim)).
    weight = jax.random.normal(kw, (output_dim, input_dim),
                               dtype=jnp.float32) * (1.0 / jnp.sqrt(input_dim))
    bias = jax.random.normal(kb, (output_dim,), dtype=jnp.float32) * 0.01

    # Case 1: 2-D input, default config (norm='none', relu).
    x = jax.random.normal(kx, (8, input_dim), dtype=jnp.float32)
    out = linear_block_forward(x, weight, bias, norm="none", activation="relu")
    out = jax.block_until_ready(out)
    pre = x @ weight.T + bias
    ref = jnp.maximum(pre, 0.0)
    assert jnp.allclose(out, ref, atol=1e-5, rtol=1e-5), "relu/none mismatch"

    # Case 1b: lrelu epilogue.
    out_lr = linear_block_forward(x, weight, bias, norm="none", activation="lrelu")
    out_lr = jax.block_until_ready(out_lr)
    ref_lr = jnp.where(pre >= 0, pre, 0.2 * pre)
    assert jnp.allclose(out_lr, ref_lr, atol=1e-5, rtol=1e-5), "lrelu mismatch"

    # Case 2: 3-D input, non-multiple-of-8 flattened batch (2*5=10),
    # LayerNorm + tanh (auto -> single-pass LN, exercises padding).
    x3 = jax.random.normal(kx2, (2, 5, input_dim), dtype=jnp.float32)
    gamma = jnp.full((output_dim,), 1.1, jnp.float32)
    beta = jnp.full((output_dim,), 0.05, jnp.float32)
    out_ln = linear_block_forward(x3, weight, bias, gamma, beta,
                                  norm="ln", activation="tanh")
    out_ln = jax.block_until_ready(out_ln)
    h = x3 @ weight.T + bias
    mu = h.mean(-1, keepdims=True)
    var = ((h - mu) ** 2).mean(-1, keepdims=True)
    ref_ln = jnp.tanh((h - mu) / jnp.sqrt(var + _LN_EPS) * gamma + beta)
    assert jnp.allclose(out_ln, ref_ln, atol=1e-4, rtol=1e-4), "ln single-pass mismatch"

    # Case 3: same LN config but forced onto the two-pass tiled-N path.
    out_ln2 = linear_block_forward(x3, weight, bias, gamma, beta,
                                   norm="ln", activation="tanh",
                                   ln_two_pass=True)
    out_ln2 = jax.block_until_ready(out_ln2)
    assert jnp.allclose(out_ln2, ref_ln, atol=1e-4, rtol=1e-4), "ln two-pass mismatch"

    # Case 4: bf16 MXU operands, f32 accumulate/epilogue (looser tolerance).
    out_bf16 = linear_block_forward(x, weight, bias, norm="none",
                                    activation="relu",
                                    matmul_dtype=jnp.bfloat16)
    out_bf16 = jax.block_until_ready(out_bf16)
    assert jnp.allclose(out_bf16, ref, atol=2e-2, rtol=2e-2), "bf16 mismatch"

    print("KERNEL_OK")
</pallas_src>

<mosaic_0001>
module attributes {stable_mosaic.version = 11 : i64} {
  func.func @_linear_kernel(%arg0: i32, %arg1: i32, %arg2: i32, %arg3: memref<8x128xf32, #tpu.memory_space<vmem>>, %arg4: memref<128x128xf32, #tpu.memory_space<vmem>>, %arg5: memref<1x128xf32, #tpu.memory_space<vmem>>, %arg6: memref<8x128xf32, #tpu.memory_space<vmem>>, %arg7: memref<8x128xf32, #tpu.memory_space<vmem>>) attributes {dimension_semantics = [#tpu.dimension_semantics<parallel>, #tpu.dimension_semantics<parallel>, #tpu.dimension_semantics<arbitrary>], iteration_bounds = array<i64: 1, 1, 1>, scalar_prefetch = 0 : i64, scratch_operands = 1 : i64, tpu.core_type = #tpu.core_type<tc>, window_params = [{transform_indices = @transform_0, window_bounds = array<i64: 8, 128>}, {transform_indices = @transform_1, window_bounds = array<i64: 128, 128>}, {transform_indices = @transform_2, window_bounds = array<i64: 1, 128>}, {transform_indices = @transform_3, window_bounds = array<i64: 8, 128>}]} {
    %c0_i32 = arith.constant 0 : i32
    %0 = arith.cmpi eq, %arg2, %c0_i32 : i32
    %1 = arith.extui %0 : i1 to i32
    %c0_i32_0 = arith.constant 0 : i32
    %2 = arith.cmpi ne, %1, %c0_i32_0 : i32
    scf.if %2 {
      %cst_10 = arith.constant 0.000000e+00 : f32
      %12 = vector.broadcast %cst_10 : f32 to vector<8x128xf32>
      %c0_11 = arith.constant 0 : index
      %c0_12 = arith.constant 0 : index
      %13 = vector.load %arg7[%c0_11, %c0_12] : memref<8x128xf32, #tpu.memory_space<vmem>>, vector<8x128xf32>
      tpu.vector_store %arg7[%c0_11, %c0_12], %12 {strides = array<i32>} : memref<8x128xf32, #tpu.memory_space<vmem>>, vector<8x128xf32>,
    } else {
    }
    %c0 = arith.constant 0 : index
    %c0_1 = arith.constant 0 : index
    %3 = vector.load %arg7[%c0, %c0_1] : memref<8x128xf32, #tpu.memory_space<vmem>>, vector<8x128xf32>
    %c0_2 = arith.constant 0 : index
    %c0_3 = arith.constant 0 : index
    %4 = vector.load %arg3[%c0_2, %c0_3] : memref<8x128xf32, #tpu.memory_space<vmem>>, vector<8x128xf32>
    %c0_4 = arith.constant 0 : index
    %c0_5 = arith.constant 0 : index
    %5 = vector.load %arg4[%c0_4, %c0_5] : memref<128x128xf32, #tpu.memory_space<vmem>>, vector<128x128xf32>
    %cst = arith.constant dense<0.000000e+00> : vector<8x128xf32>
    %6 = tpu.matmul %4, %5, %cst {dimension_numbers = #tpu.dot_dimension_numbers<[1], [0], [0], [1], [0, 0, 1, 1], [], []>} : vector<8x128xf32>, vector<128x128xf32>, vector<8x128xf32> -> vector<8x128xf32>
    %7 = arith.addf %3, %6 : vector<8x128xf32>
    %c0_6 = arith.constant 0 : index
    %c0_7 = arith.constant 0 : index
    %8 = vector.load %arg7[%c0_6, %c0_7] : memref<8x128xf32, #tpu.memory_space<vmem>>, vector<8x128xf32>
    tpu.vector_store %arg7[%c0_6, %c0_7], %7 {strides = array<i32>} : memref<8x128xf32, #tpu.memory_space<vmem>>, vector<8x128xf32>,
    %c0_i32_8 = arith.constant 0 : i32
    %9 = arith.cmpi eq, %arg2, %c0_i32_8 : i32
    %10 = arith.extui %9 : i1 to i32
    %c0_i32_9 = arith.constant 0 : i32
    %11 = arith.cmpi ne, %10, %c0_i32_9 : i32
    scf.if %11 {
      %c0_10 = arith.constant 0 : index
      %c0_11 = arith.constant 0 : index
      %12 = vector.load %arg7[%c0_10, %c0_11] : memref<8x128xf32, #tpu.memory_space<vmem>>, vector<8x128xf32>
      %c0_12 = arith.constant 0 : index
      %c0_13 = arith.constant 0 : index
      %13 = vector.load %arg5[%c0_12, %c0_13] : memref<1x128xf32, #tpu.memory_space<vmem>>, vector<1x128xf32>
      %14 = vector.broadcast %13 : vector<1x128xf32> to vector<8x128xf32>
      %15 = arith.addf %12, %14 : vector<8x128xf32>
      %cst_14 = arith.constant 0.000000e+00 : f32
      %16 = vector.broadcast %cst_14 : f32 to vector<8x128xf32>
      %17 = arith.maximumf %15, %16 : vector<8x128xf32>
      %c0_15 = arith.constant 0 : index
      %c0_16 = arith.constant 0 : index
      %18 = vector.load %arg6[%c0_15, %c0_16] : memref<8x128xf32, #tpu.memory_space<vmem>>, vector<8x128xf32>
      tpu.vector_store %arg6[%c0_15, %c0_16], %17 {strides = array<i32>} : memref<8x128xf32, #tpu.memory_space<vmem>>, vector<8x128xf32>,
    } else {
    }
    return
  }
  func.func @transform_0(%arg0: i32, %arg1: i32, %arg2: i32) -> (i32, i32) {
    %c0_i32 = arith.constant 0 : i32
    return %arg0, %arg2 : i32, i32
  }
  func.func @transform_1(%arg0: i32, %arg1: i32, %arg2: i32) -> (i32, i32) {
    %c0_i32 = arith.constant 0 : i32
    return %arg2, %arg1 : i32, i32
  }
  func.func @transform_2(%arg0: i32, %arg1: i32, %arg2: i32) -> (i32, i32) {
    %c0_i32 = arith.constant 0 : i32
    %c0_i32_0 = arith.constant 0 : i32
    return %c0_i32, %arg1 : i32, i32
  }
  func.func @transform_3(%arg0: i32, %arg1: i32, %arg2: i32) -> (i32, i32) {
    %c0_i32 = arith.constant 0 : i32
    return %arg0, %arg1 : i32, i32
  }
}

</mosaic_0001>

<bundles_post_ra>
// kernel: tpu_custom_call.1
= control target key start
LH: loop header
LB: loop body
LE: loop exit
PB: predicated region body
PF: predicated region fallthrough
CT: control target
= control target key end

     0   :  { %8 = vsyncpa [#allocation4], 0  ;;  %s240_s0 = inlined_call_operand.hbm [shape: f32[8,128], index: 0, kind: input, shape index: {}]   ;;  %s241_s1 = inlined_call_operand.hbm [shape: f32[128,128], index: 1, kind: input, shape index: {}]   ;;  %s242_s2 = inlined_call_operand.vmem [shape: f32[1,128], index: 2, kind: input, shape index: {}]   ;;  %s243_s3 = inlined_call_operand.hbm [shape: f32[8,128], index: 3, kind: output, shape index: {}]  }
   0x1   :  { %9 = vsyncpa [#allocation7], 0 }
   0x2   :  { %10 = vsyncpa [#allocation5], 0  ;;  %s16_s14 = sshll.u32 %s240_s0, 4  ;;  %s203_s15 = smov [#allocation3]   ;;  %s17_s14 = int_to_ptr.hbm [resolvable:$true] %s16_s14 }
   0x3   :  { %s18_s16 = sshll.u32 %s203_s15, 4  ;;  %s26_s19 = sshll.u32 %s241_s1, 4  ;;  %s19_s16 = int_to_ptr.vmem [resolvable:$true] %s18_s16  ;;  %s27_s19 = int_to_ptr.hbm [resolvable:$true] %s26_s19 }
   0x4   :  { %21 = dma.hbm_to_vmem [thread:$0]  %s17_s14, 128, %s19_s16, [#allocation4]  }
   0x5   :  { %s204_s20 = smov [#allocation6]   ;;  %s205_s22 = smov 128  }
   0x6   :  { %s28_s21 = sshll.u32 %s204_s20, 4  ;;  %s206_s23 = smov 8   ;;  %s29_s21 = int_to_ptr.vmem [resolvable:$true] %s28_s21 }
   0x7   :  { %34 = dma.hbm_to_vmem [thread:$0]  %s27_s19, 2048, %s29_s21, [#allocation7], %s205_s22, %s205_s22, %s206_s23  }
   0x8   :  { %197 = dma.done.wait [#allocation4], 128  }
   0x9   :  { %198 = vsyncadd [#allocation4], 4294967168 }
   0xa   :  { %199 = dma.done.wait [#allocation7], 2048  }
   0xb   :  { %200 = vsyncadd [#allocation7], 4294965248  ;;  %v67_v0 = vld [vmem:[#allocation6 + $0x78] sm:$0xff]  ;;  %v66_v1 = vld [vmem:[#allocation6 + $0x70] sm:$0xff]  ;;  %s207_s24 = smov [#allocation8]   ;;  %s108_s28 = sshll.u32 %s243_s3, 4  ;;  %s109_s28 = int_to_ptr.hbm [resolvable:$true] %s108_s28 }
   0xc   :  { %68 = vmatpush.msra.mxu0 %v67_v0  ;;  %v65_v2 = vld [vmem:[#allocation6 + $0x68] sm:$0xff]  ;;  %v64_v3 = vld [vmem:[#allocation6 + $0x60] sm:$0xff]  ;;  %v63_v4 = vld [vmem:[#allocation6 + $0x58] sm:$0xff]  ;;  %s106_s25 = sshll.u32 %s207_s24, 4  ;;  %s107_s25 = int_to_ptr.vmem [resolvable:$true] %s106_s25 }
   0xd   :  { %v62_v5 = vld [vmem:[#allocation6 + $0x50] sm:$0xff]  ;;  %v61_v6 = vld [vmem:[#allocation6 + $0x48] sm:$0xff]  ;;  %v60_v7 = vld [vmem:[#allocation6 + $0x40] sm:$0xff] }
   0xe   :  { %69 = vmatpush.msra.mxu0 %v66_v1  ;;  %v59_v8 = vld [vmem:[#allocation6 + $0x38] sm:$0xff]  ;;  %v58_v9 = vld [vmem:[#allocation6 + $0x30] sm:$0xff]  ;;  %v57_v10 = vld [vmem:[#allocation6 + $0x28] sm:$0xff] }
   0xf   :  { %v56_v11 = vld [vmem:[#allocation6 + $0x20] sm:$0xff]  ;;  %v55_v12 = vld [vmem:[#allocation6 + $0x18] sm:$0xff]  ;;  %v54_v13 = vld [vmem:[#allocation6 + $0x10] sm:$0xff] }
  0x10   :  { %70 = vmatpush.msra.mxu0 %v65_v2  ;;  %v53_v14 = vld [vmem:[#allocation6 + $0x8] sm:$0xff]  ;;  %v52_v15 = vld [vmem:[#allocation6] sm:$0xff]  ;;  %v51_v16 = vld [vmem:[#allocation3] sm:$0xff] }
  0x11   :  { %v124_v17 = vld [vmem:[%s242_s2] ss:$0 sm:$0xff] }
  0x12   :  { %71 = vmatpush.msra.mxu0 %v64_v3 }
  0x14   :  { %72 = vmatpush.msra.mxu0 %v63_v4 }
  0x16   :  { %73 = vmatpush.msra.mxu0 %v62_v5 }
  0x18   :  { %74 = vmatpush.msra.mxu0 %v61_v6 }
  0x1a   :  { %75 = vmatpush.msra.mxu0 %v60_v7 }
  0x1c   :  { %76 = vmatpush.msra.mxu0 %v59_v8 }
  0x1e   :  { %77 = vmatpush.msra.mxu0 %v58_v9 }
  0x20   :  { %78 = vmatpush.msra.mxu0 %v57_v10 }
  0x22   :  { %79 = vmatpush.msra.mxu0 %v56_v11 }
  0x24   :  { %80 = vmatpush.msra.mxu0 %v55_v12 }
  0x26   :  { %81 = vmatpush.msra.mxu0 %v54_v13 }
  0x28   :  { %82 = vmatpush.msra.mxu0 %v53_v14 }
  0x2a   :  { %83 = vmatpush.msra.mxu0 %v52_v15 }
  0x2b   :  { %84 = vmatmul.f32.vlgmr.msra.gmra.mxu0 %v51_v16 }
  0xa8   :  { %v85_v18 = vpop.f32.mrf.mxu0 }
  0xa9   :  { %v98_v19 = vadd.f32 %v124_v17, %v85_v18 }
  0xab   :  { %v99_v20 = vmax.f32 %v98_v19, 0.0 }
  0xad   :  { %100 = vst [vmem:[#allocation8] sm:$0xff] %v99_v20 }
  0xae   :  { %111 = dma.vmem_to_hbm [thread:$0]  %s107_s25, 128, %s109_s28, [#allocation5]  }
  0xaf   :  { %201 = dma.done.wait [#allocation5], 128  }
  0xb0   :  { %202 = vsyncadd [#allocation5], 4294967168 }
  0xb1   :  { %116 = vsyncpa [#allocation4], 1 }
  0xb2   :  { %117 = vsyncpa [#allocation7], 1 }
  0xb3   :  { %118 = vsyncpa [#allocation5], 1 }

</bundles_post_ra>
